<compile_context>
chip_gen: v7x
topology: tpu7x:2x2x1
jax: 0.10.0
libtpu: 0.0.40
codegen_flags: <defaults>
</compile_context>

<pallas_src>
import functools

import jax
import jax.numpy as jnp
from jax import lax
from jax.experimental import pallas as pl
from jax.experimental.pallas import tpu as pltpu


def _round_up(x: int, m: int) -> int:
    return (x + m - 1) // m * m


# ----------------------------- Pallas kernel ------------------------------- #
def self_output_kernel(x_ref, w_ref, b_ref, o_ref):
    # x_ref: (bm, H_in)     one tile of flattened tokens
    # w_ref: (H_out, H_in)  dense weight in PyTorch nn.Linear layout
    # b_ref: (1, H_out)     dense bias
    # o_ref: (bm, H_out)
    acc = lax.dot_general(
        x_ref[...], w_ref[...],
        dimension_numbers=(((1,), (1,)), ((), ())),   # x @ W.T on the MXU
        preferred_element_type=jnp.float32,
    )
    o_ref[...] = (acc + b_ref[...].astype(jnp.float32)).astype(o_ref.dtype)


# ------------------------------ JAX wrapper -------------------------------- #
def vit_self_output_forward(hidden_states, dense_w, dense_b, input_tensor=None,
                            *, block_m=512):
    """ViTSelfOutput.forward == dropout(dense(hidden_states)), p = 0.

    hidden_states: (B, S, H_in)
    dense_w:       (H_out, H_in)   (PyTorch nn.Linear layout, used as-is)
    dense_b:       (H_out,)
    input_tensor:  unused (residual is applied in ViTLayer); kept for parity.
    """
    del input_tensor  # residual is added in ViTLayer, not here (module parity)
    B, S, H_in = hidden_states.shape
    H_out, _ = dense_w.shape
    M = B * S

    # Flatten tokens to one lane-dense (M, H) slab; reshape is metadata-only.
    x = hidden_states.reshape(M, H_in)
    b = dense_b.reshape(1, H_out)

    # Tile selection: 8-aligned tiles; the ragged last block is handled by
    # Mosaic's partial-block masking (no jnp.pad / output slice needed).
    if M <= block_m and M % 8 != 0:
        bm = M                                  # single full-extent block is legal
    else:
        bm = _round_up(min(block_m, M), 8)
    # Keep >= 2 grid steps when there is enough work so the "parallel" axis can
    # be sharded across v7x's two TensorCores (harmless on v5e/v6e).
    if bm >= 16 and pl.cdiv(M, bm) < 2:
        bm = _round_up(pl.cdiv(bm, 2), 8)
    grid_m = pl.cdiv(M, bm)

    # VMEM budget: double-buffered x/out tiles + weight + bias + f32 accumulator,
    # with 2x margin; capped at 48 MiB to leave headroom on v7x (64 MiB physical).
    io_sz = jnp.dtype(hidden_states.dtype).itemsize
    w_sz = jnp.dtype(dense_w.dtype).itemsize
    vmem_need = (2 * bm * H_in * io_sz            # x tile (double buffered)
                 + 2 * bm * H_out * io_sz         # out tile (double buffered)
                 + 2 * H_out * H_in * w_sz        # weight (conservatively x2)
                 + 4 * H_out * w_sz               # bias
                 + bm * H_out * 4)                # f32 matmul accumulator
    vmem_limit = int(min(max(2 * vmem_need, 32 * 1024 * 1024), 48 * 1024 * 1024))

    out = pl.pallas_call(
        self_output_kernel,
        out_shape=jax.ShapeDtypeStruct((M, H_out), hidden_states.dtype),
        grid_spec=pltpu.PrefetchScalarGridSpec(
            num_scalar_prefetch=0,
            grid=(grid_m,),
            in_specs=[
                pl.BlockSpec((bm, H_in), lambda i: (i, 0)),
                pl.BlockSpec((H_out, H_in), lambda i: (0, 0)),   # grid-invariant
                pl.BlockSpec((1, H_out), lambda i: (0, 0)),      # grid-invariant
            ],
            out_specs=pl.BlockSpec((bm, H_out), lambda i: (i, 0)),
        ),
        compiler_params=pltpu.CompilerParams(
            dimension_semantics=("parallel",),
            vmem_limit_bytes=vmem_limit,
        ),
    )(x, dense_w, b)

    # Dropout with hidden_dropout_prob = 0.0 (eval) is the identity.
    # TODO(synk): training-mode dropout (p > 0) would need pltpu.prng_seed +
    # pltpu.stateful_bernoulli inside the kernel.
    return out.reshape(B, S, H_out)


# ---------------------------- Pure-JAX reference ---------------------------- #
def vit_self_output_reference(hidden_states, dense_w, dense_b):
    return jnp.einsum("bsh,oh->bso", hidden_states, dense_w) + dense_b[None, None, :]


# ---------------------------------- main ------------------------------------ #
if __name__ == "__main__":
    batch, seq, hidden = 2, 8, 32

    key = jax.random.PRNGKey(0)
    k_x, k_w, k_b, k_res = jax.random.split(key, 4)

    hidden_states = jax.random.normal(k_x, (batch, seq, hidden), dtype=jnp.float32)
    dense_w = jax.random.normal(k_w, (hidden, hidden), dtype=jnp.float32) * 0.02
    dense_b = jax.random.normal(k_b, (hidden,), dtype=jnp.float32) * 0.02
    # input_tensor exists in the PyTorch signature but is not used by forward.
    input_tensor = jax.random.normal(k_res, (batch, seq, hidden), dtype=jnp.float32)

    fwd = jax.jit(functools.partial(vit_self_output_forward))
    out = fwd(hidden_states, dense_w, dense_b, input_tensor)
    out = jax.block_until_ready(out)

    ref = vit_self_output_reference(hidden_states, dense_w, dense_b)
    assert out.shape == (batch, seq, hidden)
    assert jnp.allclose(out, ref, atol=1e-4, rtol=1e-4)
    print("KERNEL_OK")
</pallas_src>

<mosaic_0001>
module attributes {stable_mosaic.version = 11 : i64} {
  func.func @self_output_kernel(%arg0: i32, %arg1: memref<8x32xf32, #tpu.memory_space<vmem>>, %arg2: memref<32x32xf32, #tpu.memory_space<vmem>>, %arg3: memref<1x32xf32, #tpu.memory_space<vmem>>, %arg4: memref<8x32xf32, #tpu.memory_space<vmem>>) attributes {dimension_semantics = [#tpu.dimension_semantics<parallel>], iteration_bounds = array<i64: 2>, scalar_prefetch = 0 : i64, scratch_operands = 0 : i64, tpu.core_type = #tpu.core_type<tc>, window_params = [{transform_indices = @transform_0, window_bounds = array<i64: 8, 32>}, {pipeline_mode = #tpu.pipeline_mode<synchronous>, transform_indices = @transform_1, window_bounds = array<i64: 32, 32>}, {pipeline_mode = #tpu.pipeline_mode<synchronous>, transform_indices = @transform_2, window_bounds = array<i64: 1, 32>}, {transform_indices = @transform_3, window_bounds = array<i64: 8, 32>}]} {
    %c0 = arith.constant 0 : index
    %c0_0 = arith.constant 0 : index
    %0 = vector.load %arg1[%c0, %c0_0] : memref<8x32xf32, #tpu.memory_space<vmem>>, vector<8x32xf32>
    %c0_1 = arith.constant 0 : index
    %c0_2 = arith.constant 0 : index
    %1 = vector.load %arg2[%c0_1, %c0_2] : memref<32x32xf32, #tpu.memory_space<vmem>>, vector<32x32xf32>
    %cst = arith.constant dense<0.000000e+00> : vector<8x32xf32>
    %2 = tpu.matmul %0, %1, %cst {dimension_numbers = #tpu.dot_dimension_numbers<[1], [1], [0], [0], [0, 0, 1, 0], [], []>} : vector<8x32xf32>, vector<32x32xf32>, vector<8x32xf32> -> vector<8x32xf32>
    %c0_3 = arith.constant 0 : index
    %c0_4 = arith.constant 0 : index
    %3 = vector.load %arg3[%c0_3, %c0_4] : memref<1x32xf32, #tpu.memory_space<vmem>>, vector<1x32xf32>
    %4 = vector.broadcast %3 : vector<1x32xf32> to vector<8x32xf32>
    %5 = arith.addf %2, %4 : vector<8x32xf32>
    %c0_5 = arith.constant 0 : index
    %c0_6 = arith.constant 0 : index
    %6 = vector.load %arg4[%c0_5, %c0_6] : memref<8x32xf32, #tpu.memory_space<vmem>>, vector<8x32xf32>
    tpu.vector_store %arg4[%c0_5, %c0_6], %5 {strides = array<i32>} : memref<8x32xf32, #tpu.memory_space<vmem>>, vector<8x32xf32>,
    return
  }
  func.func @transform_0(%arg0: i32) -> (i32, i32) {
    %c0_i32 = arith.constant 0 : i32
    %c0_i32_0 = arith.constant 0 : i32
    return %arg0, %c0_i32 : i32, i32
  }
  func.func @transform_1(%arg0: i32) -> (i32, i32) {
    %c0_i32 = arith.constant 0 : i32
    %c0_i32_0 = arith.constant 0 : i32
    %c0_i32_1 = arith.constant 0 : i32
    return %c0_i32, %c0_i32_0 : i32, i32
  }
  func.func @transform_2(%arg0: i32) -> (i32, i32) {
    %c0_i32 = arith.constant 0 : i32
    %c0_i32_0 = arith.constant 0 : i32
    %c0_i32_1 = arith.constant 0 : i32
    return %c0_i32, %c0_i32_0 : i32, i32
  }
  func.func @transform_3(%arg0: i32) -> (i32, i32) {
    %c0_i32 = arith.constant 0 : i32
    %c0_i32_0 = arith.constant 0 : i32
    return %arg0, %c0_i32 : i32, i32
  }
}

</mosaic_0001>

<bundles_post_ra>
// kernel: vit_self_output_forward.1
= control target key start
LH: loop header
LB: loop body
LE: loop exit
PB: predicated region body
PF: predicated region fallthrough
CT: control target
= control target key end

     0   :  { %8 = vsyncpa [#allocation3], 0  ;;  %s861_s0 = inlined_call_operand.hbm [shape: f32[16,32], index: 0, kind: input, shape index: {}]   ;;  %s862_s1 = inlined_call_operand.hbm [shape: f32[32,32], index: 1, kind: input, shape index: {}]   ;;  %s863_s2 = inlined_call_operand.vmem [shape: f32[1,32], index: 2, kind: input, shape index: {}]   ;;  %s864_s3 = inlined_call_operand.hbm [shape: f32[16,32], index: 3, kind: output, shape index: {}]  }
   0x1   :  { %10 = vsyncpa [#allocation3 + $0x1], 0 }
   0x2   :  { %11 = vsyncpa [#allocation6], 0 }
   0x3   :  { %12 = vsyncpa [#allocation4], 0 }
   0x4   :  { %14 = vsyncpa [#allocation4 + $0x1], 0  ;;  %s658_s12 = smov 0   ;;  %s660_s13 = smov 0  }
   0x5   :  { %s662_s14 = smov 0   ;;  %s664_s15 = smov 0  }
   0x6 LB: > { %s679_s16 = sadd.s32 4294967295, %s628_s15   ;;  %s394_s17 = sadd.s32 4294967294, %s628_s15   ;;  %s628_s15 = sphi %s664_s15, %s884_s15   ;;  %s624_s14 = sphi %s662_s14, %s883_s14   ;;  %s620_s13 = sphi %s660_s13, %s882_s13   ;;  %s616_s12 = sphi %s658_s12, %s881_s12  }
   0x7   : > { %p40_p0 = scmp.ne.s32.totalorder %s620_s13, %s616_s12  ;;  %p865_p1 = scmp.eq.s32.totalorder %s679_s16, 0 }
   0x8   : > { %p112_p3 = scmp.eq.s32.totalorder %s394_s17, 1  ;;  %p395_p5 = scmp.ge.s32.totalorder %s628_s15, 1 }
   0x9   : > { %p688_p4 = por %p865_p1, %p40_p0  ;;  %p119_p7 = scmp.lt.s32.totalorder %s628_s15, 3 }
   0xa   : > { %p693_p6 = por %p112_p3, %p40_p0  ;;  %s630_s21 = smov [#allocation5]  }
   0xb   : > { %s868_s18 = scalar_select %p688_p4, 1, 0 }
   0xc   : > { %s869_s19 = scalar_select %p693_p6, 1, 0 }
   0xd   : > { %p698_p8 = pnand %p395_p5, %p119_p7  ;;  %s131_s22 = sshll.u32 %s630_s21, 4  ;;  %s702_s22 = int_to_ptr.vmem [resolvable:$true] %s131_s22 }
   0xe   : > { %s714_s24 = sadd.s32 1, %s628_s15   ;;  %s27_s25 = sadd.s32 1, %s624_s14 }
   0xf   : > { %s870_s20 = scalar_select %p698_p8, 1, 0 }
  0x10   : > { %p446_p9 = pneg %p698_p8  ;;  %s24_s26 = ssub.s32 %s628_s15, %s714_s24 }
  0x11   : > { %s500_s29 = scalar_lea.hbm %s862_s1, 512 }
  0x12   : > { %p709_p11 = pnand %p446_p9, %p865_p1  ;;  %p501_p12 = scmp.ne.s32.totalorder %s862_s1, %s500_s29 }
  0x13   : > { %p507_p5 = scmp.lt.u32.totalorder %s500_s29, %s862_s1 }
  0x14   : > { %p502_p13 = pneg %p709_p11 }
  0x16   : > { %p503_p0 = pnand %p502_p13, %p501_p12 }
  0x18   : > { %p504_p3 = pneg %p503_p0 }
  0x1a   : > { %p509_p7 = pnand %p507_p5, %p504_p3 }
  0x1c   : > { %512 = shalt.err (!%p509_p7)
}
  0x1d   : > { %s513_s7 = scalar_lea.vmem %s702_s22, 512  ;;  %p521_p2 = scmp.lt.s32.totalorder %s702_s22, %s702_s22 }
  0x1e   : > { %p514_p9 = scmp.ne.s32.totalorder %s702_s22, %s513_s7  ;;  %p522_p6 = scmp.lt.s32.totalorder %s513_s7, %s513_s7 }
  0x20   : > { %p516_p10 = pnand %p514_p9, %p502_p13  ;;  %p523_p4 = por %p522_p6, %p521_p2 }
  0x22   : > { %p517_p1 = pneg %p516_p10 }
  0x24   : > { %p524_p8 = pnand %p523_p4, %p517_p1 }
  0x26   : > { %527 = shalt.err (!%p524_p8)
}
  0x27   : > { %s631_s8 = smov 128   ;;  %s632_s9 = smov 8  }
  0x28   : > { %449 = dma.hbm_to_vmem [thread:$0]  (!%p709_p11), %s862_s1, 512, %s702_s22, [#allocation6], %s631_s8, %s631_s8, %s632_s9  }
  0x29   : > { %p25_p2 = scmp.eq.s32.totalorder %s24_s26, 0  ;;  %p34_p1 = scmp.ne.s32.totalorder %s624_s14, %s620_s13 }
  0x2a   : > { %p35_p4 = scmp.eq.s32.totalorder %s628_s15, 0  ;;  %p459_p6 = scmp.lt.s32.totalorder %s628_s15, 2 }
  0x2b   : > { %s745_s17 = scalar_select %p25_p2, %s624_s14, %s27_s25  }
  0x2c   : > { %p36_p8 = por %p35_p4, %p34_p1  ;;  %p872_p10 = scmp.eq.s32.totalorder %s679_s16, 1 }
  0x2d   : > { %s148_s27 = sand.u32 1, %s624_s14   ;;  %s399_s28 = sshll.u32 %s628_s15, 7 }
  0x2e   : > { %p749_p12 = por %p872_p10, %p34_p1  ;;  %s398_s29 = sshll.u32 %s148_s27, 3 }
  0x2f   : > { %s758_s4 = scalar_lea.hbm %s861_s0, %s399_s28  ;;  %s152_s22 = scalar_lea.vmem [#allocation2], %s398_s29 }
  0x30   : > { %s159_s25 = sshll.u32 %s152_s22, 4  ;;  %p760_p11 = pnand %p459_p6, %p36_p8  ;;  %s764_s25 = int_to_ptr.vmem [resolvable:$true] %s159_s25 }
  0x31   : > { %s149_s5 = scalar_lea.sflag [#allocation3], %s148_s27  ;;  %s528_s6 = scalar_lea.hbm %s758_s4, 128 }
  0x32   : > { %p529_p13 = scmp.ne.s32.totalorder %s758_s4, %s528_s6  ;;  %p530_p0 = pneg %p760_p11 }
  0x33   : > { %s533_s9 = scalar_lea.hbm %s861_s0, 256  ;;  %p534_p7 = scmp.lt.u32.totalorder %s758_s4, %s861_s0 }
  0x34   : > { %p531_p3 = pnand %p530_p0, %p529_p13  ;;  %p535_p9 = scmp.lt.u32.totalorder %s533_s9, %s528_s6 }
  0x35   : > { %p537_p1 = scmp.lt.u32.totalorder %s528_s6, %s758_s4 }
  0x36   : > { %p532_p5 = pneg %p531_p3  ;;  %p536_p2 = por %p535_p9, %p534_p7 }
  0x38   : > { %p538_p4 = por %p537_p1, %p536_p2 }
  0x3a   : > { %p539_p6 = pnand %p538_p4, %p532_p5 }
  0x3c   : > { %542 = shalt.err (!%p539_p6)
}
  0x3d   : > { %s543_s27 = scalar_lea.vmem %s764_s25, 128  ;;  %s633_s28 = smov [#allocation2]  }
  0x3e   : > { %p544_p8 = scmp.ne.s32.totalorder %s764_s25, %s543_s27  ;;  %s548_s29 = sshll.u32 %s633_s28, 4  ;;  %s549_s29 = int_to_ptr.vmem [resolvable:$false] %s548_s29 }
  0x3f   : > { %s550_s23 = scalar_lea.vmem %s549_s29, 256  ;;  %p551_p3 = scmp.lt.s32.totalorder %s764_s25, %s549_s29 }
  0x40   : > { %p546_p10 = pnand %p544_p8, %p530_p0  ;;  %p552_p7 = scmp.lt.s32.totalorder %s550_s23, %s543_s27 }
  0x42   : > { %p547_p13 = pneg %p546_p10  ;;  %p553_p9 = por %p552_p7, %p551_p3 }
  0x44   : > { %p554_p2 = pnand %p553_p9, %p547_p13 }
  0x46   : > { %557 = shalt.err (!%p554_p2)
}
  0x47   : > { %453 = dma.hbm_to_vmem [thread:$0]  (!%p760_p11), %s758_s4, 128, %s764_s25, %s149_s5  }
  0x48   : > { %p875_p5 = scmp.ne.s32.totalorder %s870_s20, 0 }
  0x49   : > { %s794_s30 = sand.u32 (!%p875_p5), 1, %s620_s13   ;;  %p876_p0 = scmp.ne.s32.totalorder (!%p875_p5), %s868_s18, 0 }
  0x4a   : > { %168 = sbr.rel (%p875_p5) target bundleno = 331 (0x14b), region = 32  ;;  %s401_s22 = sshll.u32 (!%p875_p5), %s794_s30, 3 }
  0x4b   : > { %s171_s6 = scalar_lea.sflag (!%p875_p5), [#allocation3], %s794_s30  ;;  %s174_s7 = scalar_lea.vmem (!%p875_p5), [#allocation2], %s401_s22 }
  0x51   : > { %603 = dma.done.wait (%p876_p0), %s171_s6, 128  }
  0x52   : > { %605 = vsyncadd (%p876_p0), %s171_s6, 4294967168  ;;  %p877_p1 = scmp.eq.s32.totalorder %s679_s16, 0 }
  0x54   : > { %607 = dma.done.wait (%p877_p1), [#allocation6], 512   ;;  %p878_p11 = pmov %p877_p1 }
  0x55   : > { %v634_v0 = vmov 0.0|0.0   ;;  %vm635_vm0 = vmmov 0   ;;  %v636_v1 = vmov 0.0   ;;  %vm213_vm1 = vcmask 261120   ;;  %v202_v2 = vld [vmem:[#allocation5] sm:$0xff]  ;;  %v203_v3 = vld [vmem:[#allocation5 + $0x8] sm:$0xff] }
  0x56   : > { %609 = vsyncadd (%p878_p11), [#allocation6], 4294966784  ;;  %430 = vmatprep.subr.bf16.mxu0 %v634_v0  ;;  %427 = vmatprep.mubr.msk.f32.mxu0 %vm635_vm0, %v636_v1  ;;  %v431_v4 = vpack.c.bf16 %v203_v3, %v202_v2  ;;  %v204_v5 = vld [vmem:[#allocation5 + $0x10] sm:$0xff]  ;;  %v205_v6 = vld [vmem:[#allocation5 + $0x18] sm:$0xff]  ;;  %s411_s4 = sshll.u32 %s679_s16, 7  ;;  %s200_s25 = scalar_lea.vmem [#allocation7], %s401_s22 }
  0x57   : > { %vm432_vm2 = vmpackc.low %vm213_vm1, %vm213_vm1  ;;  %v435_v7 = vpack.c.bf16 %v205_v6, %v204_v5  ;;  %v201_v8 = vld [vmem:[%s174_s7] sm:$0xff]  ;;  %s314_s26 = sshll.u32 %s200_s25, 4  ;;  %s816_s9 = scalar_lea.hbm %s864_s3, %s411_s4  ;;  %s818_s26 = int_to_ptr.vmem [resolvable:$true] %s314_s26 }
  0x58   : > { %433 = vmatpush3.bf16.xpose.msk.msra.mxu0 %vm432_vm2, %v431_v4  ;;  %v404_v9 = vld [vmem:[%s863_s2] ss:$0 sm:$0xff]  ;;  %s301_s10 = scalar_lea.sflag [#allocation4], %s794_s30  ;;  %s558_s11 = scalar_lea.vmem %s818_s26, 128 }
  0x59   : > { %434 = vmatprep.subr.bf16.mxu0 %v634_v0  ;;  %p559_p4 = scmp.ne.s32.totalorder %s818_s26, %s558_s11  ;;  %s637_s16 = smov [#allocation7]  }
  0x5a   : > { %s562_s27 = sshll.u32 %s637_s16, 4  ;;  %s563_s27 = int_to_ptr.vmem [resolvable:$false] %s562_s27 }
  0x5b   : > { %p560_p6 = pnand %p559_p4, %p749_p12  ;;  %s564_s28 = scalar_lea.vmem %s563_s27, 256 }
  0x5c   : > { %p565_p10 = scmp.lt.s32.totalorder %s818_s26, %s563_s27  ;;  %p566_p13 = scmp.lt.s32.totalorder %s564_s28, %s558_s11 }
  0x5d   : > { %p561_p8 = pneg %p560_p6 }
  0x5e   : > { %p567_p3 = por %p566_p13, %p565_p10 }
  0x60   : > { %437 = vmatpush3.bf16.xpose.msk.msra.mxu0 %vm432_vm2, %v435_v7  ;;  %p568_p7 = pnand %p567_p3, %p561_p8 }
  0x67   : > { %428 = vmatmul.mubr.msk.f32.vlgmr.msra.gmra.mrb[0].mxu0 %vm213_vm1, %v201_v8 }
 0x13a   : > { %v295_v10 = vpop.f32.mrb[0].mxu0 }
 0x13b   : > { %v296_v11 = vadd.f32 %v404_v9, %v295_v10  ;;  %v429_v12 = vpop.f32.mrb[1].mxu0 }
 0x13d   : > { %299 = vst.msk [vmem:[%s200_s25] sm:$0xff] %vm213_vm1, %v296_v11 }
 0x13e   : > { %571 = shalt.err (!%p568_p7)
}
 0x13f   : > { %s572_s29 = scalar_lea.hbm %s816_s9, 128  ;;  %s576_s22 = scalar_lea.hbm %s864_s3, 256 }
 0x140   : > { %p573_p9 = scmp.ne.s32.totalorder %s816_s9, %s572_s29  ;;  %p577_p0 = scmp.lt.u32.totalorder %s816_s9, %s864_s3 }
 0x141   : > { %p578_p1 = scmp.lt.u32.totalorder %s576_s22, %s572_s29  ;;  %p580_p4 = scmp.lt.u32.totalorder %s572_s29, %s816_s9 }
 0x142   : > { %p574_p2 = pnand %p573_p9, %p749_p12 }
 0x143   : > { %p579_p11 = por %p578_p1, %p577_p0 }
 0x144   : > { %p575_p5 = pneg %p574_p2 }
 0x145   : > { %p581_p6 = por %p580_p4, %p579_p11 }
 0x147   : > { %p582_p8 = pnand %p581_p6, %p575_p5 }
 0x149   : > { %585 = shalt.err (!%p582_p8)
}
 0x14a   : > { %444 = dma.vmem_to_hbm [thread:$0]  (%p749_p12), %s818_s26, 128, %s816_s9, %s301_s10  }
 0x14b PF: > { %s326_s18 = sand.u32 1, %s616_s12   ;;  %p879_p10 = scmp.ne.s32.totalorder %s869_s19, 0 }
 0x14c   : > { %p880_p13 = scmp.ge.s32.totalorder %s628_s15, 2  ;;  %s327_s20 = scalar_lea.sflag [#allocation4], %s326_s18 }
 0x14e   : > { %p455_p3 = pnand %p880_p13, %p879_p10 }
 0x150   : > { %611 = dma.done.wait (!%p455_p3), %s327_s20, 128  }
 0x151   : > { %613 = vsyncadd (!%p455_p3), %s327_s20, 4294967168  ;;  %p17_p7 = scmp.ge.s32.totalorder %s714_s24, 4   ;;  %s881_s12 = smov %s620_s13 }
 0x152   : > { %s882_s13 = smov %s624_s14  ;;  %s883_s14 = smov %s745_s17 }
 0x153   : > { %s884_s15 = smov %s714_s24  ;;  %19 = sbr.rel (!%p17_p7) target bundleno = 6 (0x6), region = 81 }
 0x15a   :  { %332 = vsyncpa [#allocation3], 1 }
 0x15b   :  { %334 = vsyncpa [#allocation3 + $0x1], 1 }
 0x15c   :  { %335 = vsyncpa [#allocation6], 1 }
 0x15d   :  { %336 = vsyncpa [#allocation4], 1 }
 0x15e   :  { %338 = vsyncpa [#allocation4 + $0x1], 1 }

</bundles_post_ra>
